<compile_context>
chip_gen: v5e
topology: v5e:2x2
jax: 0.10.0
libtpu: 0.0.40
codegen_flags: <defaults>
</compile_context>

<pallas_src>
import functools

import jax
import jax.numpy as jnp
import numpy as np
from jax.experimental import pallas as pl
from jax.experimental.pallas import tpu as pltpu


def _recourse_kernel(is_train, f_feat, *refs):
    if is_train:
        (z_ref, noise_ref, w1_ref, b1_ref, w2_ref, b2_ref,
         allow_ref, aeff_ref, wclf_ref, bclf_ref, out_ref) = refs
    else:
        (z_ref, w1_ref, b1_ref, w2_ref, b2_ref,
         allow_ref, aeff_ref, wclf_ref, bclf_ref, out_ref) = refs

    z = z_ref[...]                                       # (TB, D)
    tb, d = z.shape

    # --- encoder(z_flat): Linear(D->H) + ReLU, fused Linear(H->2F) ----------
    h = jnp.maximum(
        jnp.dot(z, w1_ref[...], preferred_element_type=jnp.float32)
        + b1_ref[...], 0.0)                              # (TB, H)
    phi = (jnp.dot(h, w2_ref[...], preferred_element_type=jnp.float32)
           + b2_ref[...])                                # (TB, 2F) [phi0 | phi1]
    phi0 = phi[:, :f_feat]                               # class-0 logits
    phi1 = phi[:, f_feat:]                               # class-1 logits

    # --- mask selection ------------------------------------------------------
    if is_train:
        # F.gumbel_softmax(phi, tau, hard=True)[:, 1] forward value:
        #   class 1 wins  <=>  (phi1 + g1)/tau > (phi0 + g0)/tau
        #                 <=>  (phi1 - phi0) + (g1 - g0) > 0
        # g1 - g0 ~ Logistic(0, 1) is sampled once per feature in the wrapper
        # (portable across TPU / interpret) and streamed in; tau drops out of
        # the hard forward value.
        logistic = noise_ref[...]                        # (TB, F)
        mask1 = ((phi1 - phi0 + logistic) > 0.0).astype(jnp.float32)
    else:
        # (sigmoid(phi1) > 0.5).float()  <=>  phi1 > 0
        mask1 = (phi1 > 0.0).astype(jnp.float32)

    # action_tensor = mask_1.view(B, -1) * intervene_allow_mask
    action = mask1 * allow_ref[...]                      # (TB, F)

    # --- downstream_for_recourse ---------------------------------------------
    # TODO(synk): downstream_for_recourse is defined outside the provided
    # module; modeled here as an additive linear-SCM intervention followed by
    # a linear classifier (clf_model) with sigmoid + 0.5 threshold.
    policy_cf = z + jnp.dot(action, aeff_ref[...],
                            preferred_element_type=jnp.float32)      # (TB, D)
    # D->1 classifier as VPU multiply + lane reduction (avoids an N=1 MXU pass)
    logit = (jnp.sum(policy_cf * wclf_ref[...], axis=-1, keepdims=True)
             + bclf_ref[...])                            # (TB, 1)
    prob = jax.nn.sigmoid(logit)
    lab = (prob > 0.5).astype(jnp.float32)

    # --- packed, lane-dense output slab --------------------------------------
    # layout: [ phi (2F) | action (F) | policy_cf (D) | prob (1) | lab (1) | 0s ]
    two_f = 2 * f_feat
    base = two_f + f_feat + d
    out_ref[:, 0:two_f] = phi
    out_ref[:, two_f:two_f + f_feat] = action
    out_ref[:, two_f + f_feat:base] = policy_cf
    out_ref[:, base:base + 1] = prob
    out_ref[:, base + 1:base + 2] = lab
    out_ref[:, base + 2:] = jnp.zeros(
        (tb, out_ref.shape[1] - (base + 2)), jnp.float32)


def recourse_forward(params, z, feat_to_intervene, *, tau=1.0, is_train=True,
                     causal_model_name="linear", num_nodes=None, z_dim=None,
                     gumbel_key=None, tile_b=512):
    """JAX/Pallas equivalent of RecourseModel.forward.

    Note: `tau` only rescales logits before the hard argmax, so it does not
    affect the forward value and is intentionally unused in the kernel.
    """
    del tau
    if causal_model_name == "vaca":
        z = z.reshape(-1, num_nodes, z_dim)              # glue, plain JAX
    batch_size = z.shape[0]
    z_flat = z.reshape(batch_size, -1).astype(jnp.float32)   # (B, D)
    B, D = z_flat.shape
    F_feat = params["w2"].shape[1] // 2

    # intervene_allow_mask (constant per call, built in plain JAX)
    allow = jnp.zeros((1, F_feat), jnp.float32).at[
        0, jnp.asarray(feat_to_intervene)].set(1.0)

    # packed output slab width (lane-dense, multiple of 128)
    k_used = 3 * F_feat + D + 2
    k_slab = max(128, ((k_used + 127) // 128) * 128)

    # batch tiling: real grid, weights VMEM-resident across steps
    TB = B if B <= tile_b else tile_b
    grid = (pl.cdiv(B, TB),)

    def _batch_spec(cols):
        return pl.BlockSpec((TB, cols), lambda i: (i, 0))

    def _resident_spec(shape):
        return pl.BlockSpec(shape, lambda i: (0,) * len(shape))

    weight_arrays = (params["w1"], params["b1"], params["w2"], params["b2"],
                     allow, params["a_eff"], params["w_clf"], params["b_clf"])

    in_arrays = [z_flat]
    in_specs = [_batch_spec(D)]

    if is_train:
        # TODO(synk): only the hard forward value of gumbel_softmax is
        # reproduced; the straight-through gradient would need a custom_vjp.
        # g1 - g0 ~ Logistic(0, 1): one sample per (row, feature).
        noise = jax.random.logistic(gumbel_key, (B, F_feat), jnp.float32)
        in_arrays.append(noise)
        in_specs.append(_batch_spec(F_feat))

    in_arrays += list(weight_arrays)
    in_specs += [_resident_spec(a.shape) for a in weight_arrays]

    kernel = functools.partial(_recourse_kernel, bool(is_train), int(F_feat))

    slab = pl.pallas_call(
        kernel,
        grid=grid,
        in_specs=in_specs,
        out_specs=pl.BlockSpec((TB, k_slab), lambda i: (i, 0)),
        out_shape=jax.ShapeDtypeStruct((B, k_slab), jnp.float32),
        compiler_params=pltpu.CompilerParams(
            dimension_semantics=("parallel",)),
    )(*in_arrays)

    # slice the packed slab apart (cheap XLA slices of one dense array)
    phi = slab[:, :2 * F_feat]
    action = slab[:, 2 * F_feat:3 * F_feat]
    policy_cf = slab[:, 3 * F_feat:3 * F_feat + D]
    prob = slab[:, 3 * F_feat + D:3 * F_feat + D + 1]
    lab = slab[:, 3 * F_feat + D + 1:3 * F_feat + D + 2]

    # phi_for_kl = phi.view(B, -1, 2); kept only for API parity — consumers
    # that can index the packed (B, 2F) [phi0 | phi1] block should do so and
    # skip this tiny stack.
    phi_for_kl = jnp.stack([phi[:, :F_feat], phi[:, F_feat:]], axis=-1)
    return policy_cf, prob, lab, action, phi_for_kl


def init_params(key, D, H, F_feat):
    ks = jax.random.split(key, 4)
    normal = lambda k, shp, scale: jax.random.normal(k, shp, jnp.float32) * scale
    return {
        # encoder: Linear(D->H) + ReLU, Linear(H->2F) with columns laid out as
        # [class-0 logits | class-1 logits] (the PyTorch interleaved view is
        # recovered by stack([phi0, phi1], -1) == phi.view(B, F, 2)).
        "w1":    normal(ks[0], (D, H), 1.0 / (D ** 0.5)),
        "b1":    jnp.zeros((1, H), jnp.float32),
        "w2":    normal(ks[1], (H, 2 * F_feat), 1.0 / (H ** 0.5)),
        "b2":    jnp.zeros((1, 2 * F_feat), jnp.float32),
        # synthetic linear causal model: intervention -> latent shift
        "a_eff": normal(ks[2], (F_feat, D), 0.5),
        # synthetic clf_model: Linear(D->1), stored as a (1, D) row for the
        # VPU mul + lane-reduce classifier path
        "w_clf": normal(ks[3], (1, D), 1.0 / (D ** 0.5)),
        "b_clf": jnp.zeros((1, 1), jnp.float32),
    }


if __name__ == "__main__":
    B, D, H, F_FEAT = 8, 32, 32, 8
    feat_to_intervene = [0, 2, 3, 5]

    root = jax.random.PRNGKey(0)
    k_params, k_z, k_gumbel = jax.random.split(root, 3)

    params = init_params(k_params, D, H, F_FEAT)
    z = jax.random.normal(k_z, (B, D), jnp.float32)      # batch.z (non-vaca)

    allow = jnp.zeros((1, F_FEAT), jnp.float32).at[
        0, jnp.asarray(feat_to_intervene)].set(1.0)

    # pure-JAX reference pieces
    h_ref = jnp.maximum(z @ params["w1"] + params["b1"], 0.0)
    phi_ref = h_ref @ params["w2"] + params["b2"]
    phi0_ref, phi1_ref = phi_ref[:, :F_FEAT], phi_ref[:, F_FEAT:]

    def downstream_ref(mask1):
        action = mask1 * allow
        policy_cf = z + action @ params["a_eff"]
        logit = (jnp.sum(policy_cf * params["w_clf"], axis=-1, keepdims=True)
                 + params["b_clf"])
        prob = jax.nn.sigmoid(logit)
        lab = (prob > 0.5).astype(jnp.float32)
        return policy_cf, prob, lab, action

    blocked = jnp.asarray([i for i in range(F_FEAT) if i not in feat_to_intervene])

    # --- training path (wrapper-sampled Logistic noise) ----------------------
    outs = recourse_forward(params, z, feat_to_intervene, tau=1.0,
                            is_train=True, gumbel_key=k_gumbel)
    outs = jax.block_until_ready(outs)
    policy_cf, prob, lab, action, phi_for_kl = outs
    assert policy_cf.shape == (B, D)
    assert prob.shape == (B, 1) and lab.shape == (B, 1)
    assert action.shape == (B, F_FEAT)
    assert phi_for_kl.shape == (B, F_FEAT, 2)
    np.testing.assert_allclose(np.asarray(phi_for_kl[..., 0]),
                               np.asarray(phi0_ref), rtol=2e-4, atol=2e-4)
    np.testing.assert_allclose(np.asarray(phi_for_kl[..., 1]),
                               np.asarray(phi1_ref), rtol=2e-4, atol=2e-4)
    # action matches the reference hard-gumbel decision with the same noise
    noise_ref = jax.random.logistic(k_gumbel, (B, F_FEAT), jnp.float32)
    mask1_ref = ((phi1_ref - phi0_ref + noise_ref) > 0.0).astype(jnp.float32)
    np.testing.assert_array_equal(np.asarray(action),
                                  np.asarray(mask1_ref * allow))
    # action is binary and zeroed outside feat_to_intervene
    assert set(np.unique(np.asarray(action))) <= {0.0, 1.0}
    assert float(jnp.abs(action[:, blocked]).sum()) == 0.0
    # downstream consistency given the sampled action
    p_ref, pr_ref, _, _ = downstream_ref(action)
    np.testing.assert_allclose(np.asarray(policy_cf), np.asarray(p_ref),
                               rtol=2e-4, atol=2e-4)
    np.testing.assert_allclose(np.asarray(prob), np.asarray(pr_ref),
                               rtol=2e-4, atol=2e-4)
    np.testing.assert_array_equal(np.asarray(lab),
                                  (np.asarray(prob) > 0.5).astype(np.float32))

    # --- eval path (deterministic, no RNG inputs) ----------------------------
    outs_e = recourse_forward(params, z, feat_to_intervene, is_train=False)
    outs_e = jax.block_until_ready(outs_e)
    policy_e, prob_e, lab_e, action_e, phi_kl_e = outs_e
    mask1_k = (phi_kl_e[..., 1] > 0.0).astype(jnp.float32)     # from kernel phi
    np.testing.assert_array_equal(np.asarray(action_e),
                                  np.asarray(mask1_k * allow))
    p_ref, pr_ref, _, _ = downstream_ref(mask1_k)
    np.testing.assert_allclose(np.asarray(policy_e), np.asarray(p_ref),
                               rtol=2e-4, atol=2e-4)
    np.testing.assert_allclose(np.asarray(prob_e), np.asarray(pr_ref),
                               rtol=2e-4, atol=2e-4)
    np.testing.assert_array_equal(np.asarray(lab_e),
                                  (np.asarray(prob_e) > 0.5).astype(np.float32))
    assert float(jnp.abs(action_e[:, blocked]).sum()) == 0.0

    print("KERNEL_OK")
</pallas_src>

<mosaic_0001>
module attributes {stable_mosaic.version = 11 : i64} {
  func.func @_recourse_kernel(%arg0: i32, %arg1: memref<8x32xf32, #tpu.memory_space<vmem>>, %arg2: memref<8x8xf32, #tpu.memory_space<vmem>>, %arg3: memref<32x32xf32, #tpu.memory_space<vmem>>, %arg4: memref<1x32xf32, #tpu.memory_space<vmem>>, %arg5: memref<32x16xf32, #tpu.memory_space<vmem>>, %arg6: memref<1x16xf32, #tpu.memory_space<vmem>>, %arg7: memref<1x8xf32, #tpu.memory_space<vmem>>, %arg8: memref<8x32xf32, #tpu.memory_space<vmem>>, %arg9: memref<1x32xf32, #tpu.memory_space<vmem>>, %arg10: memref<1x1xf32, #tpu.memory_space<vmem>>, %arg11: memref<8x128xf32, #tpu.memory_space<vmem>>) attributes {dimension_semantics = [#tpu.dimension_semantics<parallel>], iteration_bounds = array<i64: 1>, scalar_prefetch = 0 : i64, scratch_operands = 0 : i64, tpu.core_type = #tpu.core_type<tc>, window_params = [{transform_indices = @transform_0, window_bounds = array<i64: 8, 32>}, {transform_indices = @transform_1, window_bounds = array<i64: 8, 8>}, {pipeline_mode = #tpu.pipeline_mode<synchronous>, transform_indices = @transform_2, window_bounds = array<i64: 32, 32>}, {pipeline_mode = #tpu.pipeline_mode<synchronous>, transform_indices = @transform_3, window_bounds = array<i64: 1, 32>}, {pipeline_mode = #tpu.pipeline_mode<synchronous>, transform_indices = @transform_4, window_bounds = array<i64: 32, 16>}, {pipeline_mode = #tpu.pipeline_mode<synchronous>, transform_indices = @transform_5, window_bounds = array<i64: 1, 16>}, {pipeline_mode = #tpu.pipeline_mode<synchronous>, transform_indices = @transform_6, window_bounds = array<i64: 1, 8>}, {pipeline_mode = #tpu.pipeline_mode<synchronous>, transform_indices = @transform_7, window_bounds = array<i64: 8, 32>}, {pipeline_mode = #tpu.pipeline_mode<synchronous>, transform_indices = @transform_8, window_bounds = array<i64: 1, 32>}, {pipeline_mode = #tpu.pipeline_mode<synchronous>, transform_indices = @transform_9, window_bounds = array<i64: 1, 1>}, {transform_indices = @transform_10, window_bounds = array<i64: 8, 128>}]} {
    %c0 = arith.constant 0 : index
    %c0_0 = arith.constant 0 : index
    %0 = vector.load %arg1[%c0, %c0_0] : memref<8x32xf32, #tpu.memory_space<vmem>>, vector<8x32xf32>
    %c0_1 = arith.constant 0 : index
    %c0_2 = arith.constant 0 : index
    %1 = vector.load %arg3[%c0_1, %c0_2] : memref<32x32xf32, #tpu.memory_space<vmem>>, vector<32x32xf32>
    %cst = arith.constant dense<0.000000e+00> : vector<8x32xf32>
    %2 = tpu.matmul %0, %1, %cst {dimension_numbers = #tpu.dot_dimension_numbers<[1], [0], [0], [1], [0, 0, 1, 1], [], []>} : vector<8x32xf32>, vector<32x32xf32>, vector<8x32xf32> -> vector<8x32xf32>
    %c0_3 = arith.constant 0 : index
    %c0_4 = arith.constant 0 : index
    %3 = vector.load %arg4[%c0_3, %c0_4] : memref<1x32xf32, #tpu.memory_space<vmem>>, vector<1x32xf32>
    %4 = vector.broadcast %3 : vector<1x32xf32> to vector<8x32xf32>
    %5 = arith.addf %2, %4 : vector<8x32xf32>
    %cst_5 = arith.constant 0.000000e+00 : f32
    %6 = vector.broadcast %cst_5 : f32 to vector<8x32xf32>
    %7 = arith.maximumf %5, %6 : vector<8x32xf32>
    %c0_6 = arith.constant 0 : index
    %c0_7 = arith.constant 0 : index
    %8 = vector.load %arg5[%c0_6, %c0_7] : memref<32x16xf32, #tpu.memory_space<vmem>>, vector<32x16xf32>
    %cst_8 = arith.constant dense<0.000000e+00> : vector<8x16xf32>
    %9 = tpu.matmul %7, %8, %cst_8 {dimension_numbers = #tpu.dot_dimension_numbers<[1], [0], [0], [1], [0, 0, 1, 1], [], []>} : vector<8x32xf32>, vector<32x16xf32>, vector<8x16xf32> -> vector<8x16xf32>
    %c0_9 = arith.constant 0 : index
    %c0_10 = arith.constant 0 : index
    %10 = vector.load %arg6[%c0_9, %c0_10] : memref<1x16xf32, #tpu.memory_space<vmem>>, vector<1x16xf32>
    %11 = vector.broadcast %10 : vector<1x16xf32> to vector<8x16xf32>
    %12 = arith.addf %9, %11 : vector<8x16xf32>
    %13 = vector.extract_strided_slice %12 {offsets = [0, 0], sizes = [8, 8], strides = [1, 1]} : vector<8x16xf32> to vector<8x8xf32>
    %14 = vector.extract_strided_slice %12 {offsets = [0, 8], sizes = [8, 8], strides = [1, 1]} : vector<8x16xf32> to vector<8x8xf32>
    %c0_11 = arith.constant 0 : index
    %c0_12 = arith.constant 0 : index
    %15 = vector.load %arg2[%c0_11, %c0_12] : memref<8x8xf32, #tpu.memory_space<vmem>>, vector<8x8xf32>
    %16 = arith.subf %14, %13 : vector<8x8xf32>
    %17 = arith.addf %16, %15 : vector<8x8xf32>
    %cst_13 = arith.constant 0.000000e+00 : f32
    %18 = vector.broadcast %cst_13 : f32 to vector<8x8xf32>
    %19 = arith.cmpf ogt, %17, %18 : vector<8x8xf32>
    %20 = arith.extui %19 : vector<8x8xi1> to vector<8x8xi32>
    %21 = arith.sitofp %20 : vector<8x8xi32> to vector<8x8xf32>
    %c0_14 = arith.constant 0 : index
    %c0_15 = arith.constant 0 : index
    %22 = vector.load %arg7[%c0_14, %c0_15] : memref<1x8xf32, #tpu.memory_space<vmem>>, vector<1x8xf32>
    %23 = vector.broadcast %22 : vector<1x8xf32> to vector<8x8xf32>
    %24 = arith.mulf %21, %23 : vector<8x8xf32>
    %c0_16 = arith.constant 0 : index
    %c0_17 = arith.constant 0 : index
    %25 = vector.load %arg8[%c0_16, %c0_17] : memref<8x32xf32, #tpu.memory_space<vmem>>, vector<8x32xf32>
    %cst_18 = arith.constant dense<0.000000e+00> : vector<8x32xf32>
    %26 = tpu.matmul %24, %25, %cst_18 {dimension_numbers = #tpu.dot_dimension_numbers<[1], [0], [0], [1], [0, 0, 1, 1], [], []>} : vector<8x8xf32>, vector<8x32xf32>, vector<8x32xf32> -> vector<8x32xf32>
    %27 = arith.addf %0, %26 : vector<8x32xf32>
    %c0_19 = arith.constant 0 : index
    %c0_20 = arith.constant 0 : index
    %28 = vector.load %arg9[%c0_19, %c0_20] : memref<1x32xf32, #tpu.memory_space<vmem>>, vector<1x32xf32>
    %29 = vector.broadcast %28 : vector<1x32xf32> to vector<8x32xf32>
    %30 = arith.mulf %27, %29 : vector<8x32xf32>
    %cst_21 = arith.constant dense<0.000000e+00> : vector<8xf32>
    %31 = vector.multi_reduction <add>, %30, %cst_21 [1] : vector<8x32xf32> to vector<8xf32>
    %32 = vector.shape_cast %31 : vector<8xf32> to vector<8x1xf32>
    %c0_22 = arith.constant 0 : index
    %c0_23 = arith.constant 0 : index
    %33 = vector.load %arg10[%c0_22, %c0_23] : memref<1x1xf32, #tpu.memory_space<vmem>>, vector<1x1xf32>
    %34 = vector.broadcast %33 : vector<1x1xf32> to vector<8x1xf32>
    %35 = arith.addf %32, %34 : vector<8x1xf32>
    %36 = arith.negf %35 : vector<8x1xf32>
    %37 = math.exp %36 : vector<8x1xf32>
    %cst_24 = arith.constant 1.000000e+00 : f32
    %38 = vector.broadcast %cst_24 : f32 to vector<8x1xf32>
    %39 = arith.addf %38, %37 : vector<8x1xf32>
    %40 = arith.divf %38, %39 : vector<8x1xf32>
    %cst_25 = arith.constant 5.000000e-01 : f32
    %41 = vector.broadcast %cst_25 : f32 to vector<8x1xf32>
    %42 = arith.cmpf ogt, %40, %41 : vector<8x1xf32>
    %43 = arith.extui %42 : vector<8x1xi1> to vector<8x1xi32>
    %44 = arith.sitofp %43 : vector<8x1xi32> to vector<8x1xf32>
    %c0_26 = arith.constant 0 : index
    %c0_27 = arith.constant 0 : index
    %45 = vector.load %arg11[%c0_26, %c0_27] : memref<8x128xf32, #tpu.memory_space<vmem>>, vector<8x16xf32>
    tpu.vector_store %arg11[%c0_26, %c0_27], %12 {strides = array<i32>} : memref<8x128xf32, #tpu.memory_space<vmem>>, vector<8x16xf32>,
    %c0_28 = arith.constant 0 : index
    %c16 = arith.constant 16 : index
    %46 = vector.load %arg11[%c0_28, %c16] : memref<8x128xf32, #tpu.memory_space<vmem>>, vector<8x8xf32>
    tpu.vector_store %arg11[%c0_28, %c16], %24 {strides = array<i32>} : memref<8x128xf32, #tpu.memory_space<vmem>>, vector<8x8xf32>,
    %c0_29 = arith.constant 0 : index
    %c24 = arith.constant 24 : index
    %47 = vector.load %arg11[%c0_29, %c24] : memref<8x128xf32, #tpu.memory_space<vmem>>, vector<8x32xf32>
    tpu.vector_store %arg11[%c0_29, %c24], %27 {strides = array<i32>} : memref<8x128xf32, #tpu.memory_space<vmem>>, vector<8x32xf32>,
    %c0_30 = arith.constant 0 : index
    %c56 = arith.constant 56 : index
    %48 = vector.load %arg11[%c0_30, %c56] : memref<8x128xf32, #tpu.memory_space<vmem>>, vector<8x1xf32>
    tpu.vector_store %arg11[%c0_30, %c56], %40 {strides = array<i32>} : memref<8x128xf32, #tpu.memory_space<vmem>>, vector<8x1xf32>,
    %c0_31 = arith.constant 0 : index
    %c57 = arith.constant 57 : index
    %49 = vector.load %arg11[%c0_31, %c57] : memref<8x128xf32, #tpu.memory_space<vmem>>, vector<8x1xf32>
    tpu.vector_store %arg11[%c0_31, %c57], %44 {strides = array<i32>} : memref<8x128xf32, #tpu.memory_space<vmem>>, vector<8x1xf32>,
    %cst_32 = arith.constant 0.000000e+00 : f32
    %50 = vector.broadcast %cst_32 : f32 to vector<8x70xf32>
    %c0_33 = arith.constant 0 : index
    %c58 = arith.constant 58 : index
    %51 = vector.load %arg11[%c0_33, %c58] : memref<8x128xf32, #tpu.memory_space<vmem>>, vector<8x70xf32>
    tpu.vector_store %arg11[%c0_33, %c58], %50 {strides = array<i32>} : memref<8x128xf32, #tpu.memory_space<vmem>>, vector<8x70xf32>,
    return
  }
  func.func @transform_0(%arg0: i32) -> (i32, i32) {
    %c0_i32 = arith.constant 0 : i32
    %c0_i32_0 = arith.constant 0 : i32
    return %arg0, %c0_i32 : i32, i32
  }
  func.func @transform_1(%arg0: i32) -> (i32, i32) {
    %c0_i32 = arith.constant 0 : i32
    %c0_i32_0 = arith.constant 0 : i32
    return %arg0, %c0_i32 : i32, i32
  }
  func.func @transform_2(%arg0: i32) -> (i32, i32) {
    %c0_i32 = arith.constant 0 : i32
    %c0_i32_0 = arith.constant 0 : i32
    %c0_i32_1 = arith.constant 0 : i32
    return %c0_i32, %c0_i32_0 : i32, i32
  }
  func.func @transform_3(%arg0: i32) -> (i32, i32) {
    %c0_i32 = arith.constant 0 : i32
    %c0_i32_0 = arith.constant 0 : i32
    %c0_i32_1 = arith.constant 0 : i32
    return %c0_i32, %c0_i32_0 : i32, i32
  }
  func.func @transform_4(%arg0: i32) -> (i32, i32) {
    %c0_i32 = arith.constant 0 : i32
    %c0_i32_0 = arith.constant 0 : i32
    %c0_i32_1 = arith.constant 0 : i32
    return %c0_i32, %c0_i32_0 : i32, i32
  }
  func.func @transform_5(%arg0: i32) -> (i32, i32) {
    %c0_i32 = arith.constant 0 : i32
    %c0_i32_0 = arith.constant 0 : i32
    %c0_i32_1 = arith.constant 0 : i32
    return %c0_i32, %c0_i32_0 : i32, i32
  }
  func.func @transform_6(%arg0: i32) -> (i32, i32) {
    %c0_i32 = arith.constant 0 : i32
    %c0_i32_0 = arith.constant 0 : i32
    %c0_i32_1 = arith.constant 0 : i32
    return %c0_i32, %c0_i32_0 : i32, i32
  }
  func.func @transform_7(%arg0: i32) -> (i32, i32) {
    %c0_i32 = arith.constant 0 : i32
    %c0_i32_0 = arith.constant 0 : i32
    %c0_i32_1 = arith.constant 0 : i32
    return %c0_i32, %c0_i32_0 : i32, i32
  }
  func.func @transform_8(%arg0: i32) -> (i32, i32) {
    %c0_i32 = arith.constant 0 : i32
    %c0_i32_0 = arith.constant 0 : i32
    %c0_i32_1 = arith.constant 0 : i32
    return %c0_i32, %c0_i32_0 : i32, i32
  }
  func.func @transform_9(%arg0: i32) -> (i32, i32) {
    %c0_i32 = arith.constant 0 : i32
    %c0_i32_0 = arith.constant 0 : i32
    %c0_i32_1 = arith.constant 0 : i32
    return %c0_i32, %c0_i32_0 : i32, i32
  }
  func.func @transform_10(%arg0: i32) -> (i32, i32) {
    %c0_i32 = arith.constant 0 : i32
    %c0_i32_0 = arith.constant 0 : i32
    return %arg0, %c0_i32 : i32, i32
  }
}

</mosaic_0001>

<bundles_post_ra>
// kernel: tpu_custom_call.1
= control target key start
LH: loop header
LB: loop body
LE: loop exit
PB: predicated region body
PF: predicated region fallthrough
CT: control target
= control target key end

     0   :  { %s526_s0 = inlined_call_operand.vmem [shape: f32[8,32], index: 0, kind: input, shape index: {}]   ;;  %s527_s1 = inlined_call_operand.vmem [shape: f32[8,8], index: 1, kind: input, shape index: {}]   ;;  %s528_s2 = inlined_call_operand.vmem [shape: f32[32,32], index: 2, kind: input, shape index: {}]   ;;  %s529_s3 = inlined_call_operand.hbm [shape: f32[1,32], index: 3, kind: input, shape index: {}]   ;;  %s530_s4 = inlined_call_operand.vmem [shape: f32[32,16], index: 4, kind: input, shape index: {}]   ;;  %s531_s5 = inlined_call_operand.hbm [shape: f32[1,16], index: 5, kind: input, shape index: {}]   ;;  %s532_s6 = inlined_call_operand.hbm [shape: f32[1,8], index: 6, kind: input, shape index: {}]   ;;  %s533_s7 = inlined_call_operand.vmem [shape: f32[8,32], index: 7, kind: input, shape index: {}]   ;;  %s534_s8 = inlined_call_operand.vmem [shape: f32[1,32], index: 8, kind: input, shape index: {}]   ;;  %s535_s9 = inlined_call_operand.<no memory space> [shape: f32[1,1], index: 9, kind: input, shape index: {}]   ;;  %s536_s10 = inlined_call_operand.hbm [shape: f32[8,128], index: 10, kind: output, shape index: {}]  }
   0x1   :  { %v15_v0 = vstv %s535_s9 }
   0x2   :  { %16 = vst [vmem:[#allocation2] sm:$0x1] %v15_v0 }
   0x3   :  { %17 = vsyncpa [#allocation4], 0 }
   0x4   :  { %18 = vsyncpa [#allocation7], 0  ;;  %s44_s17 = sshll.u32 %s531_s5, 4  ;;  %s45_s17 = int_to_ptr.hbm [resolvable:$true] %s44_s17 }
   0x5   :  { %19 = vsyncpa [#allocation5], 0  ;;  %s400_s18 = smov [#allocation6]   ;;  %s31_s22 = sshll.u32 %s529_s3, 4  ;;  %s32_s22 = int_to_ptr.hbm [resolvable:$true] %s31_s22 }
   0x6   :  { %s46_s19 = sshll.u32 %s400_s18, 4  ;;  %s401_s23 = smov [#allocation3]   ;;  %s47_s19 = int_to_ptr.vmem [resolvable:$true] %s46_s19 }
   0x7   :  { %49 = dma.hbm_to_vmem [thread:$0]  %s45_s17, 16, %s47_s19, [#allocation7]  }
   0x8   :  { %s33_s9 = sshll.u32 %s401_s23, 4  ;;  %s55_s26 = sshll.u32 %s532_s6, 4  ;;  %s34_s9 = int_to_ptr.vmem [resolvable:$true] %s33_s9  ;;  %s56_s26 = int_to_ptr.hbm [resolvable:$true] %s55_s26 }
   0x9   :  { %36 = dma.hbm_to_vmem [thread:$0]  %s32_s22, 16, %s34_s9, [#allocation4]  }
   0xa   :  { %s402_s5 = smov [#allocation8]  }
   0xb   :  { %s57_s27 = sshll.u32 %s402_s5, 4  ;;  %s58_s27 = int_to_ptr.vmem [resolvable:$true] %s57_s27 }
   0xc   :  { %60 = dma.hbm_to_vmem [thread:$0]  %s56_s26, 16, %s58_s27, [#allocation7]  }
   0xd   :  { %394 = dma.done.wait [#allocation4], 16  }
   0xe   :  { %395 = vsyncadd [#allocation4], 4294967280 }
   0xf   :  { %396 = dma.done.wait [#allocation7], 32  }
  0x10   :  { %397 = vsyncadd [#allocation7], 4294967264  ;;  %v83_v1 = vld [vmem:[%s528_s2 + $0x18] sm:$0xff]  ;;  %v82_v2 = vld [vmem:[%s528_s2 + $0x10] sm:$0xff]  ;;  %vm88_vm0 = vcmask 261120   ;;  %vm228_vm1 = vcmask 130048  }
  0x11   :  { %104 = vmatpush.msra.mxu0 %v83_v1  ;;  %v116_v3 = vld [vmem:[%s530_s4 + $0x18] sm:$0xff]  ;;  %v81_v4 = vld [vmem:[%s528_s2 + $0x8] sm:$0xff]  ;;  %v80_v5 = vld [vmem:[%s528_s2] sm:$0xff]  ;;  %v404_v25 = vmov 0.0   ;;  %s405_s25 = smov 120   ;;  %vm169_vm3 = vcmask 64512  }
  0x12   :  { %136 = vmatpush.msra.mxu1 %v116_v3  ;;  %v79_v6 = vld [vmem:[%s526_s0] sm:$0xff]  ;;  %v115_v7 = vld [vmem:[%s530_s4 + $0x10] sm:$0xff]  ;;  %v114_v8 = vld [vmem:[%s530_s4 + $0x8] sm:$0xff]  ;;  %s403_s0 = smov 8   ;;  %vm233_vm4 = vcmask 195712   ;;  %vm239_vm5 = vcmask 457920  }
  0x13   :  { %105 = vmatpush.msra.mxu0 %v82_v2  ;;  %v113_v9 = vld [vmem:[%s530_s4] sm:$0xff]  ;;  %s408_s5 = smov 57   ;;  %vm245_vm11 = vcmask 466368   ;;  %s409_s27 = smov [#allocation9]   ;;  %vm251_vm12 = vcmask 474568   ;;  %vm253_vm13 = vcmask 1048016  }
  0x14   :  { %137 = vmatpush.msra.mxu1 %v115_v7  ;;  %v289_v10 = vld [vmem:[#allocation3] ss:$0 sm:$0xff]  ;;  %v291_v14 = vld [vmem:[#allocation8] ss:$0 sm:$0xff]  ;;  %v290_v15 = vld [vmem:[#allocation6] ss:$0 sm:$0xff] }
  0x15   :  { %106 = vmatpush.msra.mxu0 %v81_v4  ;;  %161 = vrot.lane.b32.xlu1 %v291_v14, %s403_s0  ;;  %v144_v18 = vld [vmem:[%s527_s1] sm:$0xff]  ;;  %s260_s3 = sshll.u32 %s409_s27, 4  ;;  %s262_s30 = sshll.u32 %s536_s10, 4  ;;  %s261_s3 = int_to_ptr.vmem [resolvable:$true] %s260_s3  ;;  %s263_s30 = int_to_ptr.hbm [resolvable:$true] %s262_s30 }
  0x16   :  { %138 = vmatpush.msra.mxu1 %v114_v8  ;;  %v165_v19 = vld [vmem:[%s533_s7] sm:$0xff]  ;;  %s406_s7 = smov 24  }
  0x17   :  { %107 = vmatpush.msra.mxu0 %v80_v5  ;;  %187 = vmatpush.msra.mxu2 %v165_v19  ;;  %v292_v29 = vld [vmem:[%s534_s8] ss:$0 sm:$0xff]  ;;  %s407_s8 = smov 56  }
  0x18   :  { %273 = vmatmul.msk.f32.vlgmr.msra.gmra.mxu0 %vm88_vm0, %v79_v6  ;;  %139 = vmatpush.msra.mxu1 %v113_v9  ;;  %v293_v34 = vld [vmem:[#allocation2] ss:$0 sm:$0xff] }
  0x87   :  { %v162_v24 = vpop.permute.xlu1 %161 }
  0x95   :  { %v109_v11 = vpop.f32.mrf.mxu0 }
  0x96   :  { %v110_v12 = vadd.f32 %v289_v10, %v109_v11 }
  0x98   :  { %v112_v13 = vmax.f32 %v110_v12, 0.0 }
  0x9a   :  { %274 = vmatmul.msk.f32.vlgmr.msra.gmra.mxu1 %vm88_vm0, %v112_v13 }
 0x117   :  { %v141_v16 = vpop.f32.mrf.mxu1 }
 0x118   :  { %v142_v17 = vadd.f32 %v290_v15, %v141_v16 }
 0x11a   :  { %229 = vst.msk [vmem:[#allocation9] sm:$0xff] %vm228_vm1, %v142_v17  ;;  %146 = vrot.lane.b32.xlu0 %v142_v17, %s403_s0 }
 0x122   :  { %151 = vrot.lane.b32.xlu0 %v144_v18, %s403_s0 }
 0x18c   :  { %v147_v20 = vpop.permute.xlu0 %146 }
 0x18d   :  { %v149_v21 = vsub.f32 %v142_v17, %v147_v20 }
 0x194   :  { %v152_v22 = vpop.permute.xlu0 %151 }
 0x195   :  { %v154_v23 = vadd.f32 %v152_v22, %v149_v21 }
 0x197   :  { %vm155_vm2 = vcmp.gt.f32.partialorder %v154_v23, 0.0 }
 0x198   :  { %v275_v26 = vsel %vm155_vm2, 1.0, %v404_v25 }
 0x199   :  { %v164_v27 = vmul.f32 %v275_v26, %v162_v24 }
 0x19b   :  { %167 = vrot.lane.b32.xlu1 %v164_v27, %s405_s25 }
 0x20d   :  { %v168_v28 = vpop.permute.xlu1 %167 }
 0x20e   :  { %276 = vmatmul.msk.f32.vlgmr.msra.gmra.mxu2 %vm169_vm3, %v168_v28 }
 0x291   :  { %v189_v30 = vpop.f32.mrf.mxu2 }
 0x292   :  { %v192_v31 = vadd.f32 %v189_v30, %v79_v6 }
 0x294   :  { %236 = vrot.lane.b32.xlu0 %v192_v31, %s406_s7  ;;  %v197_v32 = vmul.f32 %v292_v29, %v192_v31 }
 0x296   :  { %v198_v33 = vsel %vm88_vm0, %v197_v32, 0.0 }
 0x297   :  { %199 = vadd.xlane.f32.xlu2 %v198_v33 }
 0x2af   :  { %230 = vrot.lane.b32.xlu2 %v164_v27, %s403_s0 }
 0x306   :  { %v237_v39 = vpop.permute.xlu0 %236 }
 0x30a   :  { %v200_v35 = vpop.xlane.xlu2 %199 }
 0x30b   :  { %v205_v36 = vadd.f32 %v293_v34, %v200_v35 }
 0x30d   :  { %v277_v37 = vmul.f32 -1.442695, %v205_v36 }
 0x30f   :  { %294 = vpow2.f32 %v277_v37 }
 0x312   :  { %v231_v38 = vpop.permute.xlu2 %230 }
 0x313   :  { %234 = vst.msk [vmem:[#allocation9] sm:$0xff] %vm233_vm4, %v231_v38 }
 0x314   :  { %240 = vst.msk [vmem:[#allocation9] sm:$0xff] %vm239_vm5, %v237_v39 }
 0x315   :  { %v295_v40 = vpop.eup %294 }
 0x316   :  { %v209_v41 = vadd.f32 1.0, %v295_v40 }
 0x318   :  { %296 = vrcp.f32 %v209_v41  ;;  %v221_v45 = vand.u32 2147483648, %v209_v41  ;;  %v219_v47 = vand.u32 2147483647, %v209_v41  ;;  %vm215_vm7 = vweird.f32 %v209_v41 }
 0x31a   :  { %v222_v49 = vor.u32 1.1754944e-38, %v221_v45  ;;  %vm220_vm9 = vcmp.eq.f32.partialorder %v219_v47, 8.507059e+37 }
 0x31e   :  { %v297_v42 = vpop.eup %296 }
 0x31f   :  { %v211_v43 = vmul.f32 %v297_v42, %v209_v41  ;;  %vm216_vm6 = vweird.f32 %v297_v42 }
 0x320   :  { %vm217_vm8 = vmor %vm215_vm7, %vm216_vm6 }
 0x321   :  { %v212_v44 = vsub.f32 1.0, %v211_v43 }
 0x323   :  { %v213_v46 = vmul.f32 %v297_v42, %v212_v44 }
 0x325   :  { %v214_v48 = vadd.f32 %v297_v42, %v213_v46 }
 0x327   :  { %v218_v50 = vsel %vm217_vm8, %v297_v42, %v214_v48 }
 0x328   :  { %v223_v51 = vsel %vm220_vm9, %v222_v49, %v218_v50 }
 0x329   :  { %242 = vrot.lane.b32.xlu1 %v223_v51, %s407_s8  ;;  %vm225_vm10 = vcmp.gt.f32.partialorder %v223_v51, 0.5 }
 0x32a   :  { %v278_v52 = vsel %vm225_vm10, 1.0, %v404_v25 }
 0x32b   :  { %248 = vrot.lane.b32.xlu0 %v278_v52, %s408_s5 }
 0x39b   :  { %v243_v53 = vpop.permute.xlu1 %242 }
 0x39c   :  { %246 = vst.msk [vmem:[#allocation9] sm:$0xff] %vm245_vm11, %v243_v53 }
 0x39d   :  { %v249_v54 = vpop.permute.xlu0 %248 }
 0x39e   :  { %252 = vst.msk [vmem:[#allocation9] sm:$0xff] %vm251_vm12, %v249_v54 }
 0x39f   :  { %254 = vst.msk [vmem:[#allocation9] sm:$0xff] %vm253_vm13, %v404_v25 }
 0x3a0   :  { %265 = dma.vmem_to_hbm [thread:$0]  %s261_s3, 128, %s263_s30, [#allocation5]  }
 0x3a1   :  { %398 = dma.done.wait [#allocation5], 128  }
 0x3a2   :  { %399 = vsyncadd [#allocation5], 4294967168 }
 0x3a3   :  { %270 = vsyncpa [#allocation4], 1 }
 0x3a4   :  { %271 = vsyncpa [#allocation7], 1 }
 0x3a5   :  { %272 = vsyncpa [#allocation5], 1 }

</bundles_post_ra>
